<compile_context>
chip_gen: v7x
topology: tpu7x:2x2x1
jax: 0.10.0
libtpu: 0.0.40
codegen_flags: <defaults>
</compile_context>

<pallas_src>
import jax
import jax.numpy as jnp
from jax.experimental import pallas as pl
from jax.experimental.pallas import tpu as pltpu


def _danchor_kernel(x_ref, adj_ref, f_ref, wrel_ref, wroot_ref, b_ref, o_ref):
    # One batch block (Bb batches) per grid step. All refs are VMEM tiles.
    Bb = adj_ref.shape[0]

    f = f_ref[...]          # (A, N)      bf16  (shared across grid)
    w_rel = wrel_ref[...]   # (Din, Dpad) bf16
    w_root = wroot_ref[...] # (Din, Dpad) bf16
    bias = b_ref[...]       # (1, Dpad)   f32   (b_rel + b_root pre-summed)

    # Static unroll over the (small, capped) batch block. Each iteration's
    # intermediates feed straight into the o_ref[b] store, so nothing stays
    # live across iterations (no zs-style accumulation slabs).
    for b in range(Bb):
        x_b = x_ref[b]      # (N, Din) bf16
        adj_b = adj_ref[b]  # (N, A)   bf16

        # Anchor projection + ELU(alpha=1); bf16 MXU, f32 math for the ELU.
        h = jnp.dot(f, x_b, preferred_element_type=jnp.float32)        # (A, Din) f32
        h = jnp.where(h > 0, h, jnp.exp(jnp.minimum(h, 0.0)) - 1.0)

        # Anchor -> node aggregation: keep the MXU in bf16 (f32 accumulate),
        # then degree-normalize the f32 result rows with an EUP reciprocal.
        agg = jnp.dot(adj_b, h.astype(jnp.bfloat16),
                      preferred_element_type=jnp.float32)               # (N, Din) f32
        deg = jnp.maximum(
            jnp.sum(adj_b.astype(jnp.float32), axis=-1, keepdims=True), 1.0)
        agg = agg * pl.reciprocal(deg, approx=True)                     # (N, Din) f32

        # Two accumulating bf16 output GEMMs (lin_rel + lin_root), f32 acc,
        # bias added once (pre-summed in the wrapper). Stored directly.
        out_b = (jnp.dot(agg.astype(jnp.bfloat16), w_rel,
                         preferred_element_type=jnp.float32)
                 + jnp.dot(x_b, w_root, preferred_element_type=jnp.float32)
                 + bias)                                                # (N, Dpad) f32
        o_ref[b] = out_b.astype(o_ref.dtype)


def _pick_batch_block(B, N, A, Din, Dpad, out_bytes):
    """Batch block size: fits a conservative streamed-VMEM budget, keeps the
    grid >= 2 steps (v7x megacore) and ideally >= 4 (DMA/compute overlap),
    and caps the in-kernel unroll."""
    stream_budget = 10 << 20  # double-buffered streamed bytes per grid step
    per_b = 2 * (N * Din * 2 + N * A * 2 + N * Dpad * out_bytes)
    bb = max(1, min(B, stream_budget // max(per_b, 1)))
    if B >= 4:
        bb = min(bb, max(1, B // 4))   # >= ~4 grid steps for pipelining
    elif B >= 2:
        bb = min(bb, max(1, B // 2))   # >= 2 grid steps for the 2 TCs on v7x
    bb = min(bb, 8)                    # keep the static unroll small
    return bb


def dense_anchor_graph_conv(x, adj, f_anchor, w_rel, b_rel, w_root, b_root):
    """x: (B,N,Din) f32, adj: (B,N,A) f32, f_anchor: (A,N),
       w_rel/w_root: (Din,Dout) (already transposed), b_rel/b_root: (1,Dout)."""
    B, N, Din = x.shape
    A = f_anchor.shape[0]
    Dout = w_rel.shape[1]
    out_dtype = x.dtype
    out_bytes = jnp.dtype(out_dtype).itemsize

    # Lane-dense output columns (skip padding entirely when already aligned).
    Dpad = pl.cdiv(Dout, 128) * 128
    w_rel_bf = w_rel.astype(jnp.bfloat16)
    w_root_bf = w_root.astype(jnp.bfloat16)
    b_cat = (b_rel + b_root).astype(jnp.float32).reshape(1, Dout)
    if Dpad != Dout:
        w_rel_bf = jnp.pad(w_rel_bf, ((0, 0), (0, Dpad - Dout)))
        w_root_bf = jnp.pad(w_root_bf, ((0, 0), (0, Dpad - Dout)))
        b_cat = jnp.pad(b_cat, ((0, 0), (0, Dpad - Dout)))

    # bf16 streamed operands (halve HBM->VMEM traffic); f32 accumulation in-kernel.
    f_bf = f_anchor.astype(jnp.bfloat16)
    x_bf = x.astype(jnp.bfloat16)
    adj_bf = adj.astype(jnp.bfloat16)

    # Batch blocking.
    Bb = _pick_batch_block(B, N, A, Din, Dpad, out_bytes)
    B_pad = pl.cdiv(B, Bb) * Bb
    if B_pad != B:
        x_bf = jnp.pad(x_bf, ((0, B_pad - B), (0, 0), (0, 0)))
        adj_bf = jnp.pad(adj_bf, ((0, B_pad - B), (0, 0), (0, 0)))
    nb = B_pad // Bb

    # Explicit VMEM budget (streams double-buffered + constants + f32 intermediates).
    # TODO(synk): single-buffer the constant operands via pipeline_mode=pl.Buffered(1)
    # once that path is exercised; their footprint here is negligible.
    stream_bytes = 2 * Bb * N * (Din * 2 + A * 2 + Dpad * out_bytes)
    const_bytes = 2 * (A * N * 2 + 2 * Din * Dpad * 2 + Dpad * 4)
    interm_bytes = 4 * (A * Din + N * Din + N * Dpad + N * A) * max(2, min(Bb, 4))
    vmem_limit = int(min(40 << 20,
                         max(16 << 20, 2 * (stream_bytes + const_bytes + interm_bytes))))

    flops = (2 * B_pad * A * N * Din            # F @ x
             + 2 * B_pad * N * A * Din          # adj @ h
             + 2 * 2 * B_pad * N * Din * Dpad)  # lin_rel + lin_root GEMMs
    transcendentals = B_pad * A * Din + B_pad * N
    bytes_accessed = (x_bf.size * 2 + adj_bf.size * 2 + f_bf.size * 2
                      + w_rel_bf.size * 2 + w_root_bf.size * 2 + b_cat.size * 4
                      + B_pad * N * Dpad * out_bytes)

    out = pl.pallas_call(
        _danchor_kernel,
        out_shape=jax.ShapeDtypeStruct((B_pad, N, Dpad), out_dtype),
        grid_spec=pltpu.PrefetchScalarGridSpec(
            num_scalar_prefetch=0,
            grid=(nb,),
            in_specs=[
                pl.BlockSpec((Bb, N, Din), lambda g: (g, 0, 0)),    # x (batch block)
                pl.BlockSpec((Bb, N, A), lambda g: (g, 0, 0)),      # adj (batch block)
                pl.BlockSpec((A, N), lambda g: (0, 0)),             # F (shared)
                pl.BlockSpec((Din, Dpad), lambda g: (0, 0)),        # W_rel (shared)
                pl.BlockSpec((Din, Dpad), lambda g: (0, 0)),        # W_root (shared)
                pl.BlockSpec((1, Dpad), lambda g: (0, 0)),          # bias (shared)
            ],
            out_specs=pl.BlockSpec((Bb, N, Dpad), lambda g: (g, 0, 0)),
        ),
        compiler_params=pltpu.CompilerParams(
            dimension_semantics=("parallel",),
            vmem_limit_bytes=vmem_limit),
        cost_estimate=pl.CostEstimate(
            flops=int(flops),
            transcendentals=int(transcendentals),
            bytes_accessed=int(bytes_accessed)),
    )(x_bf, adj_bf, f_bf, w_rel_bf, w_root_bf, b_cat)

    if Dpad != Dout:
        out = out[:, :, :Dout]
    if B_pad != B:
        out = out[:B]
    return out


def _glorot(key, shape):
    fan_in, fan_out = shape[-1], shape[-2]
    lim = jnp.sqrt(6.0 / (fan_in + fan_out))
    return jax.random.uniform(key, shape, jnp.float32, -lim, lim)


def _reference(x, adj, f_anchor, w_rel, b_rel, w_root, b_root):
    # Pure-JAX reference mirroring the kernel's precision policy:
    # bf16 rounding of streamed operands / matmul inputs, f32 math elsewhere.
    hp = jax.lax.Precision.HIGHEST
    bf = lambda t: t.astype(jnp.bfloat16).astype(jnp.float32)
    xf, adjf, ff = bf(x), bf(adj), bf(f_anchor)
    wr, wo = bf(w_rel), bf(w_root)
    h = jnp.einsum("an,bnd->bad", ff, xf, precision=hp)
    h = jnp.where(h > 0, h, jnp.exp(jnp.minimum(h, 0.0)) - 1.0)
    agg = jnp.einsum("bna,bad->bnd", adjf, bf(h), precision=hp)
    deg = jnp.maximum(jnp.sum(adjf, axis=-1, keepdims=True), 1.0)
    agg = bf(agg / deg)
    return (jnp.einsum("bnd,de->bne", agg, wr, precision=hp) + b_rel
            + jnp.einsum("bnd,de->bne", xf, wo, precision=hp) + b_root)


if __name__ == "__main__":
    # Small deterministic shapes: batch=2, nodes=16, anchors=8, in_dim=32, out_dim=32
    B, N, A, Din, Dout = 2, 16, 8, 32, 32
    key = jax.random.PRNGKey(0)
    kx, kadj, kf, kwr, kwo, kbo = jax.random.split(key, 6)

    x = jax.random.normal(kx, (B, N, Din), jnp.float32)
    adj = (jax.random.uniform(kadj, (B, N, A)) > 0.5).astype(jnp.float32)

    # Parameters (glorot weights / F, zero lin_rel bias, like reset_parameters()).
    f_anchor = _glorot(kf, (A, N))
    w_rel_t = _glorot(kwr, (Dout, Din)).T            # stored torch-style, used transposed
    b_rel = jnp.zeros((1, Dout), jnp.float32)
    w_root_t = _glorot(kwo, (Dout, Din)).T
    b_root = jax.random.uniform(kbo, (1, Dout), jnp.float32, -0.1, 0.1)

    out = dense_anchor_graph_conv(x, adj, f_anchor, w_rel_t, b_rel, w_root_t, b_root)
    out = jax.block_until_ready(out)

    ref = _reference(x, adj, f_anchor, w_rel_t, b_rel, w_root_t, b_root)
    assert out.shape == (B, N, Dout)
    # Tolerance covers the EUP approx reciprocal (~2^-12) and bf16 rounding of
    # the intermediate operands fed to the MXU (mirrored in the reference).
    assert jnp.allclose(out, ref, atol=5e-3, rtol=5e-3), "mismatch vs reference"

    print("KERNEL_OK")
</pallas_src>

<mosaic_0001>
module attributes {stable_mosaic.version = 11 : i64} {
  func.func @_danchor_kernel(%arg0: i32, %arg1: memref<1x16x32xbf16, #tpu.memory_space<vmem>>, %arg2: memref<1x16x8xbf16, #tpu.memory_space<vmem>>, %arg3: memref<8x16xbf16, #tpu.memory_space<vmem>>, %arg4: memref<32x128xbf16, #tpu.memory_space<vmem>>, %arg5: memref<32x128xbf16, #tpu.memory_space<vmem>>, %arg6: memref<1x128xf32, #tpu.memory_space<vmem>>, %arg7: memref<1x16x128xf32, #tpu.memory_space<vmem>>) attributes {dimension_semantics = [#tpu.dimension_semantics<parallel>], iteration_bounds = array<i64: 2>, scalar_prefetch = 0 : i64, scratch_operands = 0 : i64, tpu.core_type = #tpu.core_type<tc>, window_params = [{transform_indices = @transform_0, window_bounds = array<i64: 1, 16, 32>}, {transform_indices = @transform_1, window_bounds = array<i64: 1, 16, 8>}, {pipeline_mode = #tpu.pipeline_mode<synchronous>, transform_indices = @transform_2, window_bounds = array<i64: 8, 16>}, {pipeline_mode = #tpu.pipeline_mode<synchronous>, transform_indices = @transform_3, window_bounds = array<i64: 32, 128>}, {pipeline_mode = #tpu.pipeline_mode<synchronous>, transform_indices = @transform_4, window_bounds = array<i64: 32, 128>}, {pipeline_mode = #tpu.pipeline_mode<synchronous>, transform_indices = @transform_5, window_bounds = array<i64: 1, 128>}, {transform_indices = @transform_6, window_bounds = array<i64: 1, 16, 128>}]} {
    %c0 = arith.constant 0 : index
    %c0_0 = arith.constant 0 : index
    %0 = vector.load %arg3[%c0, %c0_0] : memref<8x16xbf16, #tpu.memory_space<vmem>>, vector<8x16xbf16>
    %c0_1 = arith.constant 0 : index
    %c0_2 = arith.constant 0 : index
    %1 = vector.load %arg4[%c0_1, %c0_2] : memref<32x128xbf16, #tpu.memory_space<vmem>>, vector<32x128xbf16>
    %c0_3 = arith.constant 0 : index
    %c0_4 = arith.constant 0 : index
    %2 = vector.load %arg5[%c0_3, %c0_4] : memref<32x128xbf16, #tpu.memory_space<vmem>>, vector<32x128xbf16>
    %c0_5 = arith.constant 0 : index
    %c0_6 = arith.constant 0 : index
    %3 = vector.load %arg6[%c0_5, %c0_6] : memref<1x128xf32, #tpu.memory_space<vmem>>, vector<1x128xf32>
    %c0_7 = arith.constant 0 : index
    %c0_8 = arith.constant 0 : index
    %c0_9 = arith.constant 0 : index
    %4 = vector.load %arg1[%c0_7, %c0_8, %c0_9] : memref<1x16x32xbf16, #tpu.memory_space<vmem>>, vector<1x16x32xbf16>
    %5 = vector.shape_cast %4 : vector<1x16x32xbf16> to vector<16x32xbf16>
    %c0_10 = arith.constant 0 : index
    %c0_11 = arith.constant 0 : index
    %c0_12 = arith.constant 0 : index
    %6 = vector.load %arg2[%c0_10, %c0_11, %c0_12] : memref<1x16x8xbf16, #tpu.memory_space<vmem>>, vector<1x16x8xbf16>
    %7 = vector.shape_cast %6 : vector<1x16x8xbf16> to vector<16x8xbf16>
    %cst = arith.constant dense<0.000000e+00> : vector<8x32xf32>
    %8 = tpu.matmul %0, %5, %cst {dimension_numbers = #tpu.dot_dimension_numbers<[1], [0], [0], [1], [0, 0, 1, 1], [], []>} : vector<8x16xbf16>, vector<16x32xbf16>, vector<8x32xf32> -> vector<8x32xf32>
    %cst_13 = arith.constant 0.000000e+00 : f32
    %9 = vector.broadcast %cst_13 : f32 to vector<8x32xf32>
    %10 = arith.cmpf ogt, %8, %9 : vector<8x32xf32>
    %cst_14 = arith.constant 0.000000e+00 : f32
    %11 = vector.broadcast %cst_14 : f32 to vector<8x32xf32>
    %12 = arith.minimumf %8, %11 : vector<8x32xf32>
    %13 = math.exp %12 : vector<8x32xf32>
    %cst_15 = arith.constant 1.000000e+00 : f32
    %14 = vector.broadcast %cst_15 : f32 to vector<8x32xf32>
    %15 = arith.subf %13, %14 : vector<8x32xf32>
    %16 = arith.select %10, %8, %15 : vector<8x32xi1>, vector<8x32xf32>
    %17 = arith.truncf %16 : vector<8x32xf32> to vector<8x32xbf16>
    %cst_16 = arith.constant dense<0.000000e+00> : vector<16x32xf32>
    %18 = tpu.matmul %7, %17, %cst_16 {dimension_numbers = #tpu.dot_dimension_numbers<[1], [0], [0], [1], [0, 0, 1, 1], [], []>} : vector<16x8xbf16>, vector<8x32xbf16>, vector<16x32xf32> -> vector<16x32xf32>
    %19 = arith.extf %7 : vector<16x8xbf16> to vector<16x8xf32>
    %cst_17 = arith.constant dense<0.000000e+00> : vector<16xf32>
    %20 = vector.multi_reduction <add>, %19, %cst_17 [1] : vector<16x8xf32> to vector<16xf32>
    %21 = vector.shape_cast %20 : vector<16xf32> to vector<16x1xf32>
    %cst_18 = arith.constant 1.000000e+00 : f32
    %22 = vector.broadcast %cst_18 : f32 to vector<16x1xf32>
    %23 = arith.maximumf %21, %22 : vector<16x1xf32>
    %24 = tpu.reciprocal %23 {approx = true} : vector<16x1xf32> -> vector<16x1xf32>
    %25 = vector.broadcast %24 : vector<16x1xf32> to vector<16x32xf32>
    %26 = arith.mulf %18, %25 : vector<16x32xf32>
    %27 = arith.truncf %26 : vector<16x32xf32> to vector<16x32xbf16>
    %cst_19 = arith.constant dense<0.000000e+00> : vector<16x128xf32>
    %28 = tpu.matmul %27, %1, %cst_19 {dimension_numbers = #tpu.dot_dimension_numbers<[1], [0], [0], [1], [0, 0, 1, 1], [], []>} : vector<16x32xbf16>, vector<32x128xbf16>, vector<16x128xf32> -> vector<16x128xf32>
    %cst_20 = arith.constant dense<0.000000e+00> : vector<16x128xf32>
    %29 = tpu.matmul %5, %2, %cst_20 {dimension_numbers = #tpu.dot_dimension_numbers<[1], [0], [0], [1], [0, 0, 1, 1], [], []>} : vector<16x32xbf16>, vector<32x128xbf16>, vector<16x128xf32> -> vector<16x128xf32>
    %30 = arith.addf %28, %29 : vector<16x128xf32>
    %31 = vector.broadcast %3 : vector<1x128xf32> to vector<16x128xf32>
    %32 = arith.addf %30, %31 : vector<16x128xf32>
    %c0_21 = arith.constant 0 : index
    %c0_22 = arith.constant 0 : index
    %c0_23 = arith.constant 0 : index
    %33 = vector.load %arg7[%c0_21, %c0_22, %c0_23] : memref<1x16x128xf32, #tpu.memory_space<vmem>>, vector<1x16x128xf32>
    %34 = vector.shape_cast %33 : vector<1x16x128xf32> to vector<16x128xf32>
    %35 = vector.shape_cast %32 : vector<16x128xf32> to vector<1x16x128xf32>
    tpu.vector_store %arg7[%c0_21, %c0_22, %c0_23], %35 {strides = array<i32>} : memref<1x16x128xf32, #tpu.memory_space<vmem>>, vector<1x16x128xf32>,
    return
  }
  func.func @transform_0(%arg0: i32) -> (i32, i32, i32) {
    %c0_i32 = arith.constant 0 : i32
    %c0_i32_0 = arith.constant 0 : i32
    %c0_i32_1 = arith.constant 0 : i32
    return %arg0, %c0_i32, %c0_i32_0 : i32, i32, i32
  }
  func.func @transform_1(%arg0: i32) -> (i32, i32, i32) {
    %c0_i32 = arith.constant 0 : i32
    %c0_i32_0 = arith.constant 0 : i32
    %c0_i32_1 = arith.constant 0 : i32
    return %arg0, %c0_i32, %c0_i32_0 : i32, i32, i32
  }
  func.func @transform_2(%arg0: i32) -> (i32, i32) {
    %c0_i32 = arith.constant 0 : i32
    %c0_i32_0 = arith.constant 0 : i32
    %c0_i32_1 = arith.constant 0 : i32
    return %c0_i32, %c0_i32_0 : i32, i32
  }
  func.func @transform_3(%arg0: i32) -> (i32, i32) {
    %c0_i32 = arith.constant 0 : i32
    %c0_i32_0 = arith.constant 0 : i32
    %c0_i32_1 = arith.constant 0 : i32
    return %c0_i32, %c0_i32_0 : i32, i32
  }
  func.func @transform_4(%arg0: i32) -> (i32, i32) {
    %c0_i32 = arith.constant 0 : i32
    %c0_i32_0 = arith.constant 0 : i32
    %c0_i32_1 = arith.constant 0 : i32
    return %c0_i32, %c0_i32_0 : i32, i32
  }
  func.func @transform_5(%arg0: i32) -> (i32, i32) {
    %c0_i32 = arith.constant 0 : i32
    %c0_i32_0 = arith.constant 0 : i32
    %c0_i32_1 = arith.constant 0 : i32
    return %c0_i32, %c0_i32_0 : i32, i32
  }
  func.func @transform_6(%arg0: i32) -> (i32, i32, i32) {
    %c0_i32 = arith.constant 0 : i32
    %c0_i32_0 = arith.constant 0 : i32
    %c0_i32_1 = arith.constant 0 : i32
    return %arg0, %c0_i32, %c0_i32_0 : i32, i32, i32
  }
}

</mosaic_0001>

<bundles_post_ra>
// kernel: tpu_custom_call.1
= control target key start
LH: loop header
LB: loop body
LE: loop exit
PB: predicated region body
PF: predicated region fallthrough
CT: control target
= control target key end

     0   :  { %11 = vsyncpa [#allocation3], 0  ;;  %s1190_s0 = inlined_call_operand.vmem [shape: bf16[2,16,32], index: 0, kind: input, shape index: {}]   ;;  %s1191_s1 = inlined_call_operand.vmem [shape: bf16[2,16,8], index: 1, kind: input, shape index: {}]   ;;  %s1192_s2 = inlined_call_operand.hbm [shape: bf16[8,16], index: 2, kind: input, shape index: {}]   ;;  %s1193_s3 = inlined_call_operand.vmem [shape: bf16[32,128], index: 3, kind: input, shape index: {}]   ;;  %s1194_s4 = inlined_call_operand.hbm [shape: bf16[32,128], index: 4, kind: input, shape index: {}]   ;;  %s1195_s5 = inlined_call_operand.vmem [shape: f32[1,128], index: 5, kind: input, shape index: {}]   ;;  %s1196_s6 = inlined_call_operand.hbm [shape: f32[2,16,128], index: 6, kind: output, shape index: {}]  }
   0x1   :  { %12 = vsyncpa [#allocation6], 0 }
   0x2   :  { %13 = vsyncpa [#allocation4], 0 }
   0x3   :  { %15 = vsyncpa [#allocation4 + $0x1], 0  ;;  %s994_s21 = smov 0   ;;  %s996_s22 = smov 0  }
   0x4   :  { %s998_s23 = smov 0   ;;  %s1000_s24 = smov 0  }
   0x5 LB: > { %s1015_s25 = sadd.s32 4294967295, %s948_s24   ;;  %s672_s26 = sadd.s32 4294967294, %s948_s24   ;;  %s948_s24 = sphi %s1000_s24, %s1214_s24   ;;  %s944_s23 = sphi %s998_s23, %s1213_s23   ;;  %s940_s22 = sphi %s996_s22, %s1212_s22   ;;  %s936_s21 = sphi %s994_s21, %s1211_s21  }
   0x6   : > { %s1019_s27 = sadd.s32 1, %s948_s24   ;;  %s164_s28 = sadd.s32 1, %s944_s23 }
   0x7   : > { %s161_s29 = ssub.s32 %s948_s24, %s1019_s27  ;;  %p174_p0 = scmp.ne.s32.totalorder %s944_s23, %s940_s22 }
   0x8   : > { %p162_p1 = scmp.eq.s32.totalorder %s161_s29, 0  ;;  %p175_p2 = scmp.eq.s32.totalorder %s1015_s25, 1 }
   0x9   : > { %p180_p3 = scmp.ne.s32.totalorder %s940_s22, %s936_s21  ;;  %p181_p4 = scmp.eq.s32.totalorder %s672_s26, 1 }
   0xa   : > { %s1030_s30 = scalar_select %p162_p1, %s944_s23, %s164_s28  }
   0xb   : > { %p1032_p5 = por %p175_p2, %p174_p0  ;;  %p1036_p6 = por %p181_p4, %p180_p3 }
   0xc   : > { %p673_p7 = scmp.ge.s32.totalorder %s948_s24, 1  ;;  %p188_p8 = scmp.lt.s32.totalorder %s948_s24, 3 }
   0xd   : > { %s1200_s7 = scalar_select %p1032_p5, 1, 0 }
   0xe   : > { %s1201_s8 = scalar_select %p1036_p6, 1, 0 }
   0xf   : > { %p1197_p9 = scmp.eq.s32.totalorder %s1015_s25, 0  ;;  %p1043_p10 = pnand %p673_p7, %p188_p8 }
  0x10   : > { %s950_s10 = smov [#allocation2]   ;;  %s951_s12 = smov [#allocation5]  }
  0x11   : > { %s1202_s9 = scalar_select %p1043_p10, 1, 0 }
  0x12   : > { %s201_s11 = sshll.u32 %s950_s10, 4  ;;  %p753_p11 = pneg %p1043_p10  ;;  %s202_s11 = int_to_ptr.vmem [resolvable:$true] %s201_s11 }
  0x13   : > { %s214_s13 = sshll.u32 %s951_s12, 4  ;;  %s822_s17 = scalar_lea.hbm %s1192_s2, 64  ;;  %s1055_s13 = int_to_ptr.vmem [resolvable:$true] %s214_s13 }
  0x14   : > { %p1051_p12 = pnand %p1197_p9, %p753_p11  ;;  %p823_p13 = scmp.ne.s32.totalorder %s1192_s2, %s822_s17 }
  0x15   : > { %p829_p3 = scmp.lt.u32.totalorder %s822_s17, %s1192_s2 }
  0x16   : > { %p824_p0 = pneg %p1051_p12 }
  0x18   : > { %p825_p1 = pnand %p824_p0, %p823_p13 }
  0x1a   : > { %p826_p2 = pneg %p825_p1 }
  0x1c   : > { %p831_p4 = pnand %p829_p3, %p826_p2 }
  0x1e   : > { %834 = shalt.err (!%p831_p4)
}
  0x1f   : > { %s835_s28 = scalar_lea.vmem %s202_s11, 64  ;;  %p843_p9 = scmp.lt.s32.totalorder %s202_s11, %s202_s11 }
  0x20   : > { %p836_p7 = scmp.ne.s32.totalorder %s202_s11, %s835_s28  ;;  %p844_p6 = scmp.lt.s32.totalorder %s835_s28, %s835_s28 }
  0x22   : > { %p838_p8 = pnand %p836_p7, %p824_p0  ;;  %p845_p5 = por %p844_p6, %p843_p9 }
  0x24   : > { %p839_p11 = pneg %p838_p8 }
  0x26   : > { %p846_p10 = pnand %p845_p5, %p839_p11 }
  0x28   : > { %849 = shalt.err (!%p846_p10)
}
  0x29   : > { %756 = dma.hbm_to_vmem [thread:$0]  (!%p1051_p12), %s1192_s2, 64, %s202_s11, [#allocation3]  }
  0x2a   : > { %s850_s16 = scalar_lea.hbm %s1194_s4, 256 }
  0x2b   : > { %p851_p13 = scmp.ne.s32.totalorder %s1194_s4, %s850_s16  ;;  %p857_p9 = scmp.lt.u32.totalorder %s850_s16, %s1194_s4 }
  0x2d   : > { %p853_p6 = pnand %p851_p13, %p824_p0 }
  0x2f   : > { %p854_p5 = pneg %p853_p6 }
  0x31   : > { %p859_p10 = pnand %p857_p9, %p854_p5 }
  0x33   : > { %862 = shalt.err (!%p859_p10)
}
  0x34   : > { %s863_s11 = scalar_lea.vmem %s1055_s13, 256  ;;  %p871_p4 = scmp.lt.s32.totalorder %s1055_s13, %s1055_s13 }
  0x35   : > { %p864_p1 = scmp.ne.s32.totalorder %s1055_s13, %s863_s11  ;;  %p872_p7 = scmp.lt.s32.totalorder %s863_s11, %s863_s11 }
  0x37   : > { %p866_p2 = pnand %p864_p1, %p824_p0  ;;  %p873_p8 = por %p872_p7, %p871_p4 }
  0x39   : > { %p867_p3 = pneg %p866_p2 }
  0x3b   : > { %p874_p11 = pnand %p873_p8, %p867_p3 }
  0x3d   : > { %877 = shalt.err (!%p874_p11)
}
  0x3e   : > { %s952_s26 = smov 64   ;;  %s953_s28 = smov 4  }
  0x3f   : > { %759 = dma.hbm_to_vmem [thread:$0]  (!%p1051_p12), %s1194_s4, 256, %s1055_s13, [#allocation6], %s952_s26, %s952_s26, %s953_s28  }
  0x40   : > { %p1204_p13 = scmp.ne.s32.totalorder %s1202_s9, 0 }
  0x41   : > { %p1205_p0 = scmp.eq.s32.totalorder (!%p1204_p13), %s1015_s25, 0 }
  0x42   : > { %249 = sbr.rel (%p1204_p13) target bundleno = 774 (0x306), region = 44 }
  0x49   : > { %923 = dma.done.wait (%p1205_p0), [#allocation3], 64   ;;  %p1206_p6 = pmov %p1205_p0 }
  0x4a   : > { %p1207_p5 = pmov %p1205_p0 }
  0x4b   : > { %925 = vsyncadd (%p1206_p6), [#allocation3], 4294967232 }
  0x4c   : > { %927 = dma.done.wait (%p1207_p5), [#allocation6], 256   ;;  %p1208_p9 = pmov %p1205_p0 }
  0x4d   : > { %p288_p10 = scmp.lt.s32.totalorder %s1015_s25, 1  ;;  %v954_v0 = vmov 0.0   ;;  %vm955_vm0 = vmmov 0   ;;  %v299_v2 = vld [vmem:[#allocation2] sm:$0xf]  ;;  %vm319_vm1 = vcmask 130048  }
  0x4e   : > { %929 = vsyncadd (%p1208_p9), [#allocation6], 4294967040  ;;  %715 = vmatprep.subr.bf16.mxu0 %v954_v0  ;;  %717 = vmatprep.mubr.msk.bf16.mxu0 %vm955_vm0, %v954_v0  ;;  %vm375_vm2 = vcmask 64512   ;;  %v811_v8 = vld [vmem:[#allocation5] sm:$0xff]   ;;  %vm379_vm4 = vcmask 1043456   ;;  %v813_v21 = vld [vmem:[#allocation5 + $0x8] sm:$0xff]  }
  0x4f   : > { %s289_s9 = scalar_select %p288_p10, %s1015_s25, 1  ;;  %721 = vmatprep.subr.bf16.mxu1 %v954_v0  ;;  %723 = vmatprep.mubr.msk.bf16.mxu1 %vm955_vm0, %v954_v0  ;;  %v812_v20 = vld [vmem:[%s1193_s3] sm:$0xff]   ;;  %v814_v22 = vld [vmem:[%s1193_s3 + $0x8] sm:$0xff]   ;;  %vm451_vm5 = vcmask 261120  }
  0x50   : > { %s285_s28 = sand.u32 1, %s940_s22   ;;  %v696_v40 = vld [vmem:[%s1195_s5] ss:$0 sm:$0xff]  ;;  %s704_s12 = sshll.u32 %s1015_s25, 8 }
  0x51   : > { %s702_s13 = sshll.u32 %s289_s9, 3  ;;  %s680_s29 = sshll.u32 %s285_s28, 4 }
  0x52   : > { %s292_s15 = scalar_lea.vmem %s1190_s0, %s702_s13  ;;  %s297_s18 = scalar_lea.vmem %s1191_s1, %s702_s13 }
  0x53   : > { %v809_v1 = vld [vmem:[%s292_s15] sm:$0xff]   ;;  %s287_s13 = scalar_lea.vmem [#allocation7], %s680_s29  ;;  %s1147_s17 = scalar_lea.hbm %s1196_s6, %s704_s12 }
  0x54   : > { %716 = vmatpush3.bf16.msra.mxu0 %v809_v1  ;;  %v311_v3 = vld [vmem:[%s297_s18] sm:$0xff]   ;;  %s576_s14 = sshll.u32 %s287_s13, 4  ;;  %s1149_s18 = scalar_lea.sflag [#allocation4], %s285_s28  ;;  %s1142_s14 = int_to_ptr.vmem [resolvable:$true] %s576_s14 }
  0x55   : > { %727 = vmatprep.subr.bf16.mxu0 %v954_v0  ;;  %v424_v4 = vunpack.c.l.bf16 %v311_v3  ;;  %v425_v5 = vunpack.c.h.bf16 %v311_v3  ;;  %s878_s25 = scalar_lea.vmem %s1142_s14, 256  ;;  %p1209_p1 = scmp.ne.s32.totalorder %s1200_s7, 0 }
  0x56   : > { %p879_p12 = scmp.ne.s32.totalorder %s1142_s14, %s878_s25  ;;  %s956_s19 = smov [#allocation7]  }
  0x57   : > { %718 = vmatmul.mubr.msk.bf16.vlgmr.msra.gmra.mrb[0].mxu0 %vm319_vm1, %v299_v2  ;;  %v426_v6 = vsel %vm375_vm2, %v424_v4, 0.0  ;;  %v429_v7 = vsel %vm375_vm2, %v425_v5, 0.0  ;;  %s882_s20 = sshll.u32 %s956_s19, 4  ;;  %s883_s20 = int_to_ptr.vmem [resolvable:$false] %s882_s20 }
  0x58   : > { %731 = vmatprep.mubr.msk.bf16.mxu0 %vm955_vm0, %v954_v0  ;;  %427 = vadd.xlane.f32.xlu0 %v426_v6  ;;  %p880_p2 = pnand %p879_p12, %p1209_p1  ;;  %s884_s11 = scalar_lea.vmem %s883_s20, 512 }
  0x59   : > { %728 = vmatpush3.bf16.msra.mxu0 %v811_v8  ;;  %p885_p4 = scmp.lt.s32.totalorder %s1142_s14, %s883_s20  ;;  %p886_p7 = scmp.lt.s32.totalorder %s884_s11, %s878_s25 }
  0x5a   : > { %729 = vmatprep.subr.bf16.mxu0 %v954_v0  ;;  %p881_p3 = pneg %p880_p2 }
  0x5b   : > { %p887_p8 = por %p886_p7, %p885_p4 }
  0x5c   : > { %430 = vadd.xlane.f32.xlu0 %v429_v7 }
  0x5d   : > { %730 = vmatpush3.bf16.msra.mxu0 %v813_v21  ;;  %p888_p11 = pnand %p887_p8, %p881_p3 }
  0x60   : > { %732 = vmatmul.mubr.msk.bf16.vlgmr.msra.gmra.mrb[4].mxu0 %vm451_vm5, %v809_v1 }
  0xe5   : > { %v428_v23 = vpop.xlane.xlu0 %427 }
  0xe6   : > { %v432_v26 = vmax.f32 %v428_v23, 1.0 }
  0xe9   : > { %v431_v24 = vpop.xlane.xlu0 %430 }
  0xea   : > { %v433_v25 = vmax.f32 %v431_v24, 1.0 }
 0x12a   : > { %v357_v9 = vpop.f32.mrb[0].mxu0 }
 0x12b   : > { %v364_v10 = vmin.f32 %v357_v9, 0.0  ;;  %v719_v11 = vpop.f32.mrb[1].mxu0  ;;  %vm363_vm3 = vcmp.gt.f32.partialorder %v357_v9, 0.0 }
 0x12c   : > { %v360_v12 = vpop.f32.mrb[2].mxu0 }
 0x12d   : > { %v365_v13 = vmul.f32 1.442695, %v364_v10  ;;  %v720_v14 = vpop.f32.mrb[3].mxu0 }
 0x12f   : > { %816 = vpow2.f32 %v365_v13 }
 0x130   : > { %818 = vrcp.f32 %v433_v25 }
 0x131   : > { %820 = vrcp.f32 %v432_v26 }
 0x133   : > { %v489_v36 = vpop.f32.mrb[4].mxu0 }
 0x134   : > { %v733_v37 = vpop.f32.mrb[5].mxu0 }
 0x135   : > { %v492_v38 = vpop.f32.mrb[6].mxu0 }
 0x136   : > { %v734_v39 = vpop.f32.mrb[7].mxu0 }
 0x139   : > { %v817_v15 = vpop.eup %816 }
 0x13a   : > { %v687_v16 = vadd.f32 -1.0, %v817_v15  ;;  %v819_v27 = vpop.eup %818 }
 0x13b   : > { %v821_v30 = vpop.eup %820 }
 0x13c   : > { %v368_v17 = vsel %vm363_vm3, %v357_v9, %v687_v16 }
 0x13d   : > { %v369_v18 = vpack.c.bf16 %v368_v17, %v368_v17 }
 0x13f   : > { %v381_v19 = vsel %vm379_vm4, %v369_v18, 0 }
 0x140   : > { %722 = vmatpush3.bf16.msra.mxu1 %v381_v19 }
 0x141   : > { %735 = vmatprep.subr.bf16.mxu1 %v954_v0 }
 0x143   : > { %724 = vmatmul.mubr.msk.bf16.vlgmr.msra.gmra.mrb[0].mxu1 %vm375_vm2, %v311_v3 }
 0x144   : > { %736 = vmatpush3.bf16.msra.mxu1 %v812_v20  ;;  %739 = vmatprep.mubr.msk.bf16.mxu1 %vm955_vm0, %v954_v0 }
 0x145   : > { %737 = vmatprep.subr.bf16.mxu1 %v954_v0 }
 0x148   : > { %738 = vmatpush3.bf16.msra.mxu1 %v814_v22 }
 0x216   : > { %v417_v28 = vpop.f32.mrb[0].mxu1 }
 0x217   : > { %v725_v29 = vpop.f32.mrb[1].mxu1  ;;  %v436_v32 = vmul.f32 %v821_v30, %v417_v28 }
 0x218   : > { %v420_v31 = vpop.f32.mrb[2].mxu1 }
 0x219   : > { %v437_v33 = vmul.f32 %v819_v27, %v420_v31  ;;  %v726_v34 = vpop.f32.mrb[3].mxu1 }
 0x21b   : > { %v438_v35 = vpack.c.bf16 %v437_v33, %v436_v32 }
 0x21d   : > { %740 = vmatmul.mubr.msk.bf16.vlgmr.msra.gmra.mrb[4].mxu1 %vm451_vm5, %v438_v35 }
 0x2f0   : > { %v545_v41 = vpop.f32.mrb[4].mxu1 }
 0x2f1   : > { %v546_v42 = vadd.f32 %v545_v41, %v489_v36  ;;  %v741_v43 = vpop.f32.mrb[5].mxu1 }
 0x2f2   : > { %v548_v44 = vpop.f32.mrb[6].mxu1 }
 0x2f3   : > { %v558_v45 = vadd.f32 %v696_v40, %v546_v42  ;;  %v549_v46 = vadd.f32 %v548_v44, %v492_v38  ;;  %v742_v47 = vpop.f32.mrb[7].mxu1 }
 0x2f5   : > { %560 = vst [vmem:[%s287_s13] sm:$0xff] %v558_v45  ;;  %v559_v48 = vadd.f32 %v696_v40, %v549_v46 }
 0x2f7   : > { %561 = vst [vmem:[%s287_s13 + $0x8] sm:$0xff] %v559_v48 }
 0x2f8   : > { %891 = shalt.err (!%p888_p11)
}
 0x2f9   : > { %s892_s26 = scalar_lea.hbm %s1147_s17, 256  ;;  %s896_s10 = scalar_lea.hbm %s1196_s6, 512 }
 0x2fa   : > { %p893_p13 = scmp.ne.s32.totalorder %s1147_s17, %s892_s26  ;;  %p897_p5 = scmp.lt.u32.totalorder %s1147_s17, %s1196_s6 }
 0x2fb   : > { %p898_p9 = scmp.lt.u32.totalorder %s896_s10, %s892_s26  ;;  %p900_p12 = scmp.lt.u32.totalorder %s892_s26, %s1147_s17 }
 0x2fc   : > { %p894_p0 = pnand %p893_p13, %p1209_p1 }
 0x2fd   : > { %p899_p10 = por %p898_p9, %p897_p5 }
 0x2fe   : > { %p895_p6 = pneg %p894_p0 }
 0x2ff   : > { %p901_p2 = por %p900_p12, %p899_p10 }
 0x301   : > { %p902_p3 = pnand %p901_p2, %p895_p6 }
 0x303   : > { %905 = shalt.err (!%p902_p3)
}
 0x304   : > { %s957_s12 = smov 128   ;;  %s958_s15 = smov 8  }
 0x305   : > { %751 = dma.vmem_to_hbm [thread:$0]  (%p1209_p1), %s1142_s14, 256, %s1147_s17, %s1149_s18, %s957_s12, %s957_s12, %s958_s15  }
 0x306 PF: > { %p768_p4 = scmp.ge.s32.totalorder %s948_s24, 2  ;;  %s591_s16 = sand.u32 1, %s936_s21  }
 0x307   : > { %p1210_p7 = scmp.ne.s32.totalorder %s1201_s8, 0  ;;  %s592_s25 = scalar_lea.sflag [#allocation4], %s591_s16 }
 0x309   : > { %p761_p8 = pnand %p768_p4, %p1210_p7 }
 0x30b   : > { %931 = dma.done.wait (!%p761_p8), %s592_s25, 256  }
 0x30c   : > { %933 = vsyncadd (!%p761_p8), %s592_s25, 4294967040  ;;  %p18_p11 = scmp.ge.s32.totalorder %s1019_s27, 4   ;;  %s1211_s21 = smov %s940_s22 }
 0x30d   : > { %s1212_s22 = smov %s944_s23  ;;  %s1213_s23 = smov %s1030_s30 }
 0x30e   : > { %s1214_s24 = smov %s1019_s27  ;;  %20 = sbr.rel (!%p18_p11) target bundleno = 5 (0x5), region = 91 }
 0x315   :  { %597 = vsyncpa [#allocation3], 1 }
 0x316   :  { %599 = vsyncpa [#allocation3 + $0x1], 1 }
 0x317   :  { %600 = vsyncpa [#allocation6], 1 }
 0x318   :  { %601 = vsyncpa [#allocation4], 1 }
 0x319   :  { %603 = vsyncpa [#allocation4 + $0x1], 1 }

</bundles_post_ra>
